<compile_context>
chip_gen: v7x
topology: tpu7x:2x2x1
jax: 0.10.0
libtpu: 0.0.40
codegen_flags: <defaults>
</compile_context>

<pallas_src>
import jax
import jax.numpy as jnp
from jax.experimental import pallas as pl
from jax.experimental.pallas import tpu as pltpu

IN_FEATURES = 1536   # K
OUT_FEATURES = 196   # true N
N_PAD = 256          # lane-dense padded N (multiple of 128; natural MXU tile)


def _linear_kernel(x_ref, w_ref, b_ref, o_ref):
    # x_ref: (B, K) f32, w_ref: (K, N_PAD) bf16 (pre-transposed, pre-padded),
    # b_ref: (1, N_PAD) f32, o_ref: (B, N_PAD) f32.
    x_bf16 = x_ref[...].astype(jnp.bfloat16)          # tiny cast, VPU
    o_ref[...] = (
        jnp.dot(x_bf16, w_ref[...], preferred_element_type=jnp.float32)
        + b_ref[...]                                   # f32 bias add
    )


def prepare_params(weight, bias):
    """One-time prep of PyTorch-layout params.

    weight: (196, 1536) f32 -> (1536, 256) bf16  (K-major, N zero-padded)
    bias:   (196,)      f32 -> (1, 256)    f32   (zero-padded)
    """
    w_kn = jnp.pad(weight.T, ((0, 0), (0, N_PAD - OUT_FEATURES))).astype(jnp.bfloat16)
    b2d = jnp.pad(bias, (0, N_PAD - OUT_FEATURES)).reshape(1, N_PAD).astype(jnp.float32)
    return w_kn, b2d


def _linear_padded(x2d, w_kn, b2d):
    """(B, 1536) f32 x (1536, 256) bf16 + bias -> (B, 256) f32 (lane-dense)."""
    B = x2d.shape[0]
    # Whole problem (<1 MiB weight + tiny activations for small B) fits
    # trivially in VMEM and is a single tile of work -> gridless pallas_call,
    # full-array VMEM blocks, no pipelining / double-buffering.
    return pl.pallas_call(
        _linear_kernel,
        out_shape=jax.ShapeDtypeStruct((B, N_PAD), jnp.float32),
        in_specs=[
            pl.BlockSpec(memory_space=pltpu.MemorySpace.VMEM),
            pl.BlockSpec(memory_space=pltpu.MemorySpace.VMEM),
            pl.BlockSpec(memory_space=pltpu.MemorySpace.VMEM),
        ],
        out_specs=pl.BlockSpec(memory_space=pltpu.MemorySpace.VMEM),
        cost_estimate=pl.CostEstimate(
            flops=2 * B * IN_FEATURES * N_PAD,
            transcendentals=0,
            bytes_accessed=(
                IN_FEATURES * N_PAD * 2      # bf16 weight
                + B * IN_FEATURES * 4        # f32 x
                + B * N_PAD * 4              # f32 out
                + N_PAD * 4                  # f32 bias
            ),
        ),
    )(x2d, w_kn, b2d)


@jax.jit
def my_model_forward(x, w_kn, b2d):
    """Module-exact forward. x: (1536,) f32 -> (14, 14) f32.

    Jitted so the lane-padding strip + view(14,14) fuse with the kernel call
    instead of becoming separate tiny dispatches.
    """
    x2d = x.reshape(1, IN_FEATURES)
    y = _linear_padded(x2d, w_kn, b2d)
    return y[0, :OUT_FEATURES].reshape(14, 14)


@jax.jit
def my_model_forward_batched(xb, w_kn, b2d):
    """Throughput API: xb (B, 1536) f32 -> (B, 196) f32.

    Amortizes the weight DMA and per-call dispatch across B samples (review
    item #2). For very large B, tile B in a grid sized for v7x's 64 MiB VMEM.
    """
    y = _linear_padded(xb, w_kn, b2d)
    return y[:, :OUT_FEATURES]


def init_params(key):
    """Deterministic init mimicking PyTorch nn.Linear default (U(-1/sqrt(K), 1/sqrt(K)))."""
    kw, kb = jax.random.split(key)
    bound = 1.0 / (IN_FEATURES ** 0.5)
    weight = jax.random.uniform(
        kw, (OUT_FEATURES, IN_FEATURES), jnp.float32, minval=-bound, maxval=bound
    )
    bias = jax.random.uniform(
        kb, (OUT_FEATURES,), jnp.float32, minval=-bound, maxval=bound
    )
    return weight, bias


if __name__ == "__main__":
    key = jax.random.PRNGKey(0)
    k_x, k_p, k_b = jax.random.split(key, 3)

    x = jax.random.normal(k_x, (IN_FEATURES,), jnp.float32)
    weight, bias = init_params(k_p)

    # One-time param prep (transpose + pad + bf16 cast) — amortized across calls.
    w_kn, b2d = prepare_params(weight, bias)
    w_kn, b2d = jax.block_until_ready((w_kn, b2d))

    # --- single-sample (module-exact) path ---
    out = my_model_forward(x, w_kn, b2d)
    out = jax.block_until_ready(out)

    ref = (x @ weight.T + bias).reshape(14, 14)
    assert out.shape == (14, 14)
    # bf16 weight: relax tolerance vs. the f32 reference (per review).
    assert jnp.allclose(out, ref, atol=2e-2, rtol=2e-2), float(
        jnp.max(jnp.abs(out - ref))
    )

    # --- batched path (amortizes weight DMA / dispatch) ---
    B = 8
    xb = jax.random.normal(k_b, (B, IN_FEATURES), jnp.float32)
    out_b = jax.block_until_ready(my_model_forward_batched(xb, w_kn, b2d))
    ref_b = xb @ weight.T + bias
    assert out_b.shape == (B, OUT_FEATURES)
    assert jnp.allclose(out_b, ref_b, atol=2e-2, rtol=2e-2), float(
        jnp.max(jnp.abs(out_b - ref_b))
    )

    print("KERNEL_OK")
</pallas_src>

<mosaic_0001>
module attributes {stable_mosaic.version = 11 : i64} {
  func.func @_linear_kernel(%arg0: memref<1x1536xf32, #tpu.memory_space<vmem>>, %arg1: memref<1536x256xbf16, #tpu.memory_space<vmem>>, %arg2: memref<1x256xf32, #tpu.memory_space<vmem>>, %arg3: memref<1x256xf32, #tpu.memory_space<vmem>>) attributes {dimension_semantics = [], scalar_prefetch = 0 : i64, scratch_operands = 0 : i64, tpu.core_type = #tpu.core_type<tc>} {
    %c0 = arith.constant 0 : index
    %c0_0 = arith.constant 0 : index
    %0 = vector.load %arg0[%c0, %c0_0] : memref<1x1536xf32, #tpu.memory_space<vmem>>, vector<1x1536xf32>
    %1 = arith.truncf %0 : vector<1x1536xf32> to vector<1x1536xbf16>
    %c0_1 = arith.constant 0 : index
    %c0_2 = arith.constant 0 : index
    %2 = vector.load %arg1[%c0_1, %c0_2] : memref<1536x256xbf16, #tpu.memory_space<vmem>>, vector<1536x256xbf16>
    %cst = arith.constant dense<0.000000e+00> : vector<1x256xf32>
    %3 = tpu.matmul %1, %2, %cst {dimension_numbers = #tpu.dot_dimension_numbers<[1], [0], [0], [1], [0, 0, 1, 1], [], []>} : vector<1x1536xbf16>, vector<1536x256xbf16>, vector<1x256xf32> -> vector<1x256xf32>
    %c0_3 = arith.constant 0 : index
    %c0_4 = arith.constant 0 : index
    %4 = vector.load %arg2[%c0_3, %c0_4] : memref<1x256xf32, #tpu.memory_space<vmem>>, vector<1x256xf32>
    %5 = arith.addf %3, %4 : vector<1x256xf32>
    %c0_5 = arith.constant 0 : index
    %c0_6 = arith.constant 0 : index
    %6 = vector.load %arg3[%c0_5, %c0_6] : memref<1x256xf32, #tpu.memory_space<vmem>>, vector<1x256xf32>
    tpu.vector_store %arg3[%c0_5, %c0_6], %5 {strides = array<i32>} : memref<1x256xf32, #tpu.memory_space<vmem>>, vector<1x256xf32>,
    return
  }
}

</mosaic_0001>

<bundles_post_ra>
// kernel: squeeze.1
= control target key start
LH: loop header
LB: loop body
LE: loop exit
PB: predicated region body
PF: predicated region fallthrough
CT: control target
= control target key end

     0   :  { %s199_s0 = inlined_call_operand.vmem [shape: f32[196], index: 0, kind: input, shape index: {}]   ;;  %s200_s1 = inlined_call_operand.hbm [shape: f32[14,14], index: 1, kind: output, shape index: {}]  }
   0x1   :  { %v5_v0 = vld [vmem:[%s199_s0] sm:$0x3] }
   0x2   :  { %6 = vst [vmem:[#allocation2] sm:$0x3] %v5_v0 }
   0x3   :  { %2 = vsyncpa [#allocation1], 0  ;;  %s147_s0 = smov 116   ;;  %s148_s8 = smov 114   ;;  %vm89_vm0 = vcmask 1031168   ;;  %vm8_vm1 = vcmask 113664  }
   0x4   :  { %s149_s9 = smov 100   ;;  %s150_s10 = smov 102   ;;  %vm93_vm2 = vcmask 15360   ;;  %vm96_vm3 = vcmask 113680  }
   0x5   :  { %s151_s11 = smov 2   ;;  %s152_s12 = smov 88  }
   0x6   :  { %s153_s13 = smov 86   ;;  %s154_s14 = smov 74  }
   0x7   :  { %s155_s15 = smov 72   ;;  %s156_s16 = smov 58  }
   0x8   :  { %s157_s17 = smov 44   ;;  %s158_s18 = smov 30  }
   0x9   :  { %v11_v1 = vld [vmem:[#allocation2 + $0x1] sm:$0x1]   ;;  %v17_v2 = vld [vmem:[#allocation2] sm:$0x1]   ;;  %s159_s19 = smov 16   ;;  %s160_s20 = smov [#allocation0]  }
   0xa   :  { %12 = vrot.lane.b32.xlu0 %v11_v1, %s147_s0  ;;  %18 = vrot.lane.b32.xlu1 %v17_v2, %s148_s8  ;;  %v30_v3 = vld [vmem:[#allocation2] sm:$0x1]   ;;  %v24_v4 = vld [vmem:[#allocation2 + $0x1] sm:$0x1]   ;;  %s103_s21 = sshll.u32 %s160_s20, 4  ;;  %s104_s21 = int_to_ptr.vmem [resolvable:$true] %s103_s21 }
   0xb   :  { %v86_v5 = vld [vmem:[#allocation2] sm:$0x1]   ;;  %v88_v6 = vld [vmem:[#allocation2 + $0x1] sm:$0x1]   ;;  %s123_s22 = scalar_lea.vmem %s104_s21, 256  ;;  %p128_p1 = scmp.lt.s32.totalorder %s104_s21, %s104_s21 }
   0xc   :  { %v90_v7 = vsel %vm89_vm0, %v88_v6, %v86_v5  ;;  %v37_v8 = vld [vmem:[#allocation2 + $0x1] sm:$0x1]   ;;  %v43_v9 = vld [vmem:[#allocation2] sm:$0x1]   ;;  %p124_p0 = scmp.ne.s32.totalorder %s104_s21, %s123_s22  ;;  %p129_p2 = scmp.lt.s32.totalorder %s123_s22, %s123_s22 }
   0xd   :  { %v50_v10 = vld [vmem:[#allocation2 + $0x1] sm:$0x1]   ;;  %v7_v11 = vld [vmem:[#allocation2] sm:$0x1]  }
   0xe   :  { %31 = vrot.lane.b32.xlu0 %v30_v3, %s149_s9  ;;  %25 = vrot.lane.b32.xlu1 %v24_v4, %s150_s10  ;;  %9 = vst.msk [vmem:[#allocation0] sm:$0x1] %vm8_vm1, %v7_v11   ;;  %v56_v12 = vld [vmem:[#allocation2] sm:$0x1]   ;;  %p130_p3 = por %p129_p2, %p128_p1 }
   0xf   :  { %v62_v13 = vld [vmem:[#allocation2] sm:$0x1]  }
  0x10   :  { %v68_v14 = vld [vmem:[#allocation2] sm:$0x1]   ;;  %p131_p4 = pnand %p130_p3, %p124_p0 }
  0x11   :  { %v74_v15 = vld [vmem:[#allocation2] sm:$0x1]  }
  0x12   :  { %91 = vrot.lane.b32.xlu0 %v90_v7, %s151_s11  ;;  %38 = vrot.lane.b32.xlu1 %v37_v8, %s152_s12  ;;  %v80_v16 = vld [vmem:[#allocation2] sm:$0x1]  }
  0x16   :  { %44 = vrot.lane.b32.xlu0 %v43_v9, %s153_s13  ;;  %51 = vrot.lane.b32.xlu1 %v50_v10, %s154_s14 }
  0x1a   :  { %57 = vrot.lane.b32.xlu0 %v56_v12, %s155_s15  ;;  %63 = vrot.lane.b32.xlu1 %v62_v13, %s156_s16 }
  0x1e   :  { %69 = vrot.lane.b32.xlu0 %v68_v14, %s157_s17  ;;  %75 = vrot.lane.b32.xlu1 %v74_v15, %s158_s18 }
  0x22   :  { %81 = vrot.lane.b32.xlu0 %v80_v16, %s159_s19 }
  0x7c   :  { %v13_v17 = vpop.permute.xlu0 %12   ;;  %v19_v18 = vpop.permute.xlu1 %18  }
  0x7d   :  { %16 = vst.msk [vmem:[#allocation0 + $0xa] sm:$0x1] %vm8_vm1, %v13_v17   ;;  %22 = vst.msk [vmem:[#allocation0 + $0x1] sm:$0x1] %vm8_vm1, %v19_v18  }
  0x80   :  { %v32_v19 = vpop.permute.xlu0 %31   ;;  %v26_v20 = vpop.permute.xlu1 %25  }
  0x81   :  { %35 = vst.msk [vmem:[#allocation0 + $0x2] sm:$0x1] %vm8_vm1, %v32_v19   ;;  %29 = vst.msk [vmem:[#allocation0 + $0xb] sm:$0x1] %vm8_vm1, %v26_v20  }
  0x84   :  { %v92_v21 = vpop.permute.xlu0 %91   ;;  %v39_v22 = vpop.permute.xlu1 %38  }
  0x85   :  { %95 = vst.msk [vmem:[#allocation0 + $0x9] sm:$0x1] %vm93_vm2, %v92_v21  }
  0x86   :  { %42 = vst.msk [vmem:[#allocation0 + $0xc] sm:$0x1] %vm8_vm1, %v39_v22  }
  0x87   :  { %98 = vst.msk [vmem:[#allocation0 + $0x9] sm:$0x1] %vm96_vm3, %v92_v21  }
  0x88   :  { %v45_v23 = vpop.permute.xlu0 %44   ;;  %v52_v24 = vpop.permute.xlu1 %51  }
  0x89   :  { %48 = vst.msk [vmem:[#allocation0 + $0x3] sm:$0x1] %vm8_vm1, %v45_v23   ;;  %55 = vst.msk [vmem:[#allocation0 + $0xd] sm:$0x1] %vm8_vm1, %v52_v24  }
  0x8c   :  { %v58_v25 = vpop.permute.xlu0 %57   ;;  %v64_v26 = vpop.permute.xlu1 %63  }
  0x8d   :  { %61 = vst.msk [vmem:[#allocation0 + $0x4] sm:$0x1] %vm8_vm1, %v58_v25   ;;  %67 = vst.msk [vmem:[#allocation0 + $0x5] sm:$0x1] %vm8_vm1, %v64_v26  }
  0x90   :  { %v70_v27 = vpop.permute.xlu0 %69   ;;  %v76_v28 = vpop.permute.xlu1 %75  }
  0x91   :  { %73 = vst.msk [vmem:[#allocation0 + $0x6] sm:$0x1] %vm8_vm1, %v70_v27   ;;  %79 = vst.msk [vmem:[#allocation0 + $0x7] sm:$0x1] %vm8_vm1, %v76_v28  }
  0x94   :  { %v82_v29 = vpop.permute.xlu0 %81  }
  0x95   :  { %85 = vst.msk [vmem:[#allocation0 + $0x8] sm:$0x1] %vm8_vm1, %v82_v29  }
  0x96   :  { %134 = shalt.err (!%p131_p4)
}
  0x97   :  { %s135_s25 = scalar_lea.hbm %s200_s1, 256 }
  0x98   :  { %p136_p5 = scmp.ne.s32.totalorder %s200_s1, %s135_s25  ;;  %p139_p6 = scmp.lt.u32.totalorder %s135_s25, %s200_s1 }
  0x9a   :  { %p141_p7 = pnand %p139_p6, %p136_p5 }
  0x9c   :  { %144 = shalt.err (!%p141_p7)
}
  0x9d   :  { %106 = dma.vmem_to_hbm [thread:$0]  %s104_s21, 256, %s200_s1, [#allocation1]  }
  0x9e   :  { %145 = dma.done.wait [#allocation1], 256  }
  0x9f   :  { %146 = vsyncadd [#allocation1], 4294967040 }
  0xa0   :  { %108 = vsyncpa [#allocation1], 1 }

// kernel: my_model_forward.1
= control target key start
LH: loop header
LB: loop body
LE: loop exit
PB: predicated region body
PF: predicated region fallthrough
CT: control target
= control target key end

     0   :  { %8 = vsyncpa [#allocation3], 0  ;;  %s2070_s12 = smov [#allocation2]   ;;  %s2169_s0 = inlined_call_operand.vmem [shape: f32[1,1536], index: 0, kind: input, shape index: {}]   ;;  %s2170_s1 = inlined_call_operand.hbm [shape: bf16[1536,256], index: 1, kind: input, shape index: {}]   ;;  %s2171_s2 = inlined_call_operand.vmem [shape: f32[1,256], index: 2, kind: input, shape index: {}]   ;;  %s2172_s3 = inlined_call_operand.vmem [shape: f32[1,256], index: 3, kind: output, shape index: {}]  }
   0x1   :  { %s16_s13 = sshll.u32 %s2070_s12, 4  ;;  %s2046_s16 = scalar_lea.hbm %s2170_s1, 24576  ;;  %s17_s13 = int_to_ptr.vmem [resolvable:$true] %s16_s13 }
   0x2   :  { %p2047_p0 = scmp.ne.s32.totalorder %s2170_s1, %s2046_s16  ;;  %p2050_p1 = scmp.lt.u32.totalorder %s2046_s16, %s2170_s1 }
   0x4   :  { %p2052_p2 = pnand %p2050_p1, %p2047_p0 }
   0x6   :  { %2055 = shalt.err (!%p2052_p2)
}
   0x7   :  { %s2056_s21 = scalar_lea.vmem %s17_s13, 24576  ;;  %p2061_p4 = scmp.lt.s32.totalorder %s17_s13, %s17_s13 }
   0x8   :  { %p2057_p3 = scmp.ne.s32.totalorder %s17_s13, %s2056_s21  ;;  %p2062_p5 = scmp.lt.s32.totalorder %s2056_s21, %s2056_s21 }
   0xa   :  { %p2063_p6 = por %p2062_p5, %p2061_p4 }
   0xc   :  { %p2064_p7 = pnand %p2063_p6, %p2057_p3 }
   0xe   :  { %2067 = shalt.err (!%p2064_p7)
}
   0xf   :  { %s2071_s22 = smov 128   ;;  %s2072_s23 = smov 8  }
  0x10   :  { %22 = dma.hbm_to_vmem [thread:$0]  %s2170_s1, 24576, %s17_s13, [#allocation3], %s2071_s22, %s2071_s22, %s2072_s23  }
  0x11   :  { %2068 = dma.done.wait [#allocation3], 24576  }
  0x12   :  { %2069 = vsyncadd [#allocation3], 4294942720  ;;  %v1758_v0 = vld [vmem:[#allocation2 + $0x4] ss:$8 sps:$4 sm:$0xff]   ;;  %v1762_v2 = vld [vmem:[#allocation2] ss:$8 sps:$4 sm:$0xff]   ;;  %v32_v36 = vlaneseq }
  0x13   :  { %v1760_v1 = vld [vmem:[#allocation2 + $0x304] ss:$8 sps:$4 sm:$0xff]   ;;  %1268 = vmatprep.subr.bf16.mxu1 %v1758_v0  ;;  %v1763_v3 = vld [vmem:[#allocation2 + $0x300] ss:$8 sps:$4 sm:$0xff]   ;;  %v1764_v4 = vld [vmem:[#allocation2 + $0x14] ss:$8 sps:$4 sm:$0xff]  }
  0x14   :  { %1391 = vmatprep.subr.bf16.mxu0 %v1760_v1  ;;  %1269 = vmatpush1.bf16.msra.mxu1 %v1762_v2  ;;  %v1766_v5 = vld [vmem:[#allocation2 + $0x314] ss:$8 sps:$4 sm:$0xff]   ;;  %v1768_v6 = vld [vmem:[#allocation2 + $0x10] ss:$8 sps:$4 sm:$0xff]   ;;  %v1770_v8 = vld [vmem:[#allocation2 + $0x24] ss:$8 sps:$4 sm:$0xff]  }
  0x15   :  { %1392 = vmatpush1.bf16.msra.mxu0 %v1763_v3  ;;  %1270 = vmatprep.subr.bf16.mxu1 %v1764_v4  ;;  %v1769_v7 = vld [vmem:[#allocation2 + $0x310] ss:$8 sps:$4 sm:$0xff]   ;;  %v1772_v9 = vld [vmem:[#allocation2 + $0x324] ss:$8 sps:$4 sm:$0xff]   ;;  %v1774_v10 = vld [vmem:[#allocation2 + $0x20] ss:$8 sps:$4 sm:$0xff]  }
  0x16   :  { %1393 = vmatprep.subr.bf16.mxu0 %v1766_v5  ;;  %v1775_v11 = vld [vmem:[#allocation2 + $0x320] ss:$8 sps:$4 sm:$0xff]   ;;  %v1776_v12 = vld [vmem:[#allocation2 + $0x34] ss:$8 sps:$4 sm:$0xff]   ;;  %v1780_v14 = vld [vmem:[#allocation2 + $0x30] ss:$8 sps:$4 sm:$0xff]  }
  0x17   :  { %v1778_v13 = vld [vmem:[#allocation2 + $0x334] ss:$8 sps:$4 sm:$0xff]   ;;  %v1781_v15 = vld [vmem:[#allocation2 + $0x330] ss:$8 sps:$4 sm:$0xff]   ;;  %v1782_v16 = vld [vmem:[#allocation2 + $0x44] ss:$8 sps:$4 sm:$0xff]  }
  0x18   :  { %1271 = vmatpush1.bf16.msra.mxu1 %v1768_v6  ;;  %v1784_v17 = vld [vmem:[#allocation2 + $0x344] ss:$8 sps:$4 sm:$0xff]   ;;  %v1786_v18 = vld [vmem:[#allocation2 + $0x40] ss:$8 sps:$4 sm:$0xff]   ;;  %v1788_v20 = vld [vmem:[#allocation2 + $0x54] ss:$8 sps:$4 sm:$0xff]  }
  0x19   :  { %1394 = vmatpush1.bf16.msra.mxu0 %v1769_v7  ;;  %1272 = vmatprep.subr.bf16.mxu1 %v1770_v8  ;;  %v1787_v19 = vld [vmem:[#allocation2 + $0x340] ss:$8 sps:$4 sm:$0xff]   ;;  %v1790_v21 = vld [vmem:[#allocation2 + $0x354] ss:$8 sps:$4 sm:$0xff]   ;;  %v1792_v22 = vld [vmem:[#allocation2 + $0x50] ss:$8 sps:$4 sm:$0xff]  }
  0x1a   :  { %1395 = vmatprep.subr.bf16.mxu0 %v1772_v9  ;;  %v1793_v23 = vld [vmem:[#allocation2 + $0x350] ss:$8 sps:$4 sm:$0xff]   ;;  %v1794_v24 = vld [vmem:[#allocation2 + $0x64] ss:$8 sps:$4 sm:$0xff]   ;;  %v1798_v26 = vld [vmem:[#allocation2 + $0x60] ss:$8 sps:$4 sm:$0xff]  }
  0x1b   :  { %v1796_v25 = vld [vmem:[#allocation2 + $0x364] ss:$8 sps:$4 sm:$0xff]   ;;  %v1799_v27 = vld [vmem:[#allocation2 + $0x360] ss:$8 sps:$4 sm:$0xff]   ;;  %v1800_v28 = vld [vmem:[#allocation2 + $0x74] ss:$8 sps:$4 sm:$0xff]  }
  0x1c   :  { %1273 = vmatpush1.bf16.msra.mxu1 %v1774_v10  ;;  %v1802_v29 = vld [vmem:[#allocation2 + $0x374] ss:$8 sps:$4 sm:$0xff]   ;;  %v1804_v30 = vld [vmem:[#allocation2 + $0x70] ss:$8 sps:$4 sm:$0xff]   ;;  %v1806_v32 = vld [vmem:[#allocation2 + $0x84] ss:$8 sps:$4 sm:$0xff]  }
  0x1d   :  { %1396 = vmatpush1.bf16.msra.mxu0 %v1775_v11  ;;  %1274 = vmatprep.subr.bf16.mxu1 %v1776_v12  ;;  %v1805_v31 = vld [vmem:[#allocation2 + $0x370] ss:$8 sps:$4 sm:$0xff]   ;;  %v1808_v33 = vld [vmem:[#allocation2 + $0x384] ss:$8 sps:$4 sm:$0xff]   ;;  %v1810_v34 = vld [vmem:[#allocation2 + $0x80] ss:$8 sps:$4 sm:$0xff]  }
  0x1e   :  { %1397 = vmatprep.subr.bf16.mxu0 %v1778_v13  ;;  %v1811_v35 = vld [vmem:[#allocation2 + $0x380] ss:$8 sps:$4 sm:$0xff]   ;;  %v1812_v37 = vld [vmem:[#allocation2 + $0x94] ss:$8 sps:$4 sm:$0xff]   ;;  %v1816_v39 = vld [vmem:[#allocation2 + $0x90] ss:$8 sps:$4 sm:$0xff]  }
  0x1f   :  { %v1814_v38 = vld [vmem:[#allocation2 + $0x394] ss:$8 sps:$4 sm:$0xff]   ;;  %v2107_v40 = vshrl.u32 %v32_v36, 7  ;;  %v1817_v41 = vld [vmem:[#allocation2 + $0x390] ss:$8 sps:$4 sm:$0xff]   ;;  %v2116_v50 = vld [vmem:[%s2169_s0] sm:$0xff] }
  0x20   :  { %1275 = vmatpush1.bf16.msra.mxu1 %v1780_v14  ;;  %v1818_v42 = vld [vmem:[#allocation2 + $0xa4] ss:$8 sps:$4 sm:$0xff]   ;;  %v1822_v44 = vld [vmem:[#allocation2 + $0xa0] ss:$8 sps:$4 sm:$0xff]   ;;  %v1824_v48 = vld [vmem:[#allocation2 + $0xb4] ss:$8 sps:$4 sm:$0xff]  }
  0x21   :  { %1398 = vmatpush1.bf16.msra.mxu0 %v1781_v15  ;;  %1276 = vmatprep.subr.bf16.mxu1 %v1782_v16  ;;  %v1820_v43 = vld [vmem:[#allocation2 + $0x3a4] ss:$8 sps:$4 sm:$0xff]   ;;  %v1823_v45 = vld [vmem:[#allocation2 + $0x3a0] ss:$8 sps:$4 sm:$0xff]   ;;  %v2110_v46 = vsub.s32 1, %v2107_v40  ;;  %v62_v47 = vsub.s32 7, %v2107_v40 }
  0x22   :  { %1399 = vmatprep.subr.bf16.mxu0 %v1784_v17  ;;  %v1826_v49 = vld [vmem:[#allocation2 + $0x3b4] ss:$8 sps:$4 sm:$0xff]   ;;  %v1828_v51 = vld [vmem:[#allocation2 + $0xb0] ss:$8 sps:$4 sm:$0xff]   ;;  %v1830_v55 = vld [vmem:[#allocation2 + $0xc4] ss:$8 sps:$4 sm:$0xff]  }
  0x23   :  { %v39_v52 = vrot.slane %v2116_v50, %v2110_v46  ;;  %v63_v53 = vrot.slane %v2116_v50, %v62_v47  ;;  %v1829_v54 = vld [vmem:[#allocation2 + $0x3b0] ss:$8 sps:$4 sm:$0xff]   ;;  %v1832_v56 = vld [vmem:[#allocation2 + $0x3c4] ss:$8 sps:$4 sm:$0xff]   ;;  %v1834_v59 = vld [vmem:[#allocation2 + $0xc0] ss:$8 sps:$4 sm:$0xff]  }
  0x24   :  { %1277 = vmatpush1.bf16.msra.mxu1 %v1786_v18  ;;  %v1835_v60 = vld [vmem:[#allocation2 + $0x3c0] ss:$8 sps:$4 sm:$0xff]   ;;  %v1836_v61 = vld [vmem:[#allocation2 + $0xd4] ss:$8 sps:$4 sm:$0xff]   ;;  %v1840_v63 = vld [vmem:[#allocation2 + $0xd0] ss:$8 sps:$4 sm:$0xff]  }
  0x25   :  { %1400 = vmatpush1.bf16.msra.mxu0 %v1787_v19  ;;  %1278 = vmatprep.subr.bf16.mxu1 %v1788_v20  ;;  %v93_v57 = vpack.c.bf16 %v39_v52, %v39_v52  ;;  %v99_v58 = vpack.c.bf16 %v63_v53, %v63_v53  ;;  %v1838_v62 = vld [vmem:[#allocation2 + $0x3d4] ss:$8 sps:$4 sm:$0xff]   ;;  %v1841_v0 = vld [vmem:[#allocation2 + $0x3d0] ss:$8 sps:$4 sm:$0xff]   ;;  %v1842_v1 = vld [vmem:[#allocation2 + $0xe4] ss:$8 sps:$4 sm:$0xff]  }
  0x26   :  { %1401 = vmatprep.subr.bf16.mxu0 %v1790_v21  ;;  %v1844_v2 = vld [vmem:[#allocation2 + $0x3e4] ss:$8 sps:$4 sm:$0xff]   ;;  %v1846_v3 = vld [vmem:[#allocation2 + $0xe0] ss:$8 sps:$4 sm:$0xff]   ;;  %v2122_v4 = vsub.s32 0, %v2107_v40  ;;  %v58_v5 = vsub.s32 6, %v2107_v40 }
  0x27   :  { %1300 = vmatprep.mubr.bf16.mxu1 %v93_v57  ;;  %1423 = vmatprep.mubr.bf16.mxu0 %v99_v58  ;;  %v1847_v6 = vld [vmem:[#allocation2 + $0x3e0] ss:$8 sps:$4 sm:$0xff]   ;;  %v1848_v7 = vld [vmem:[#allocation2 + $0xf4] ss:$8 sps:$4 sm:$0xff]   ;;  %v46_v9 = vsub.s32 3, %v2107_v40  ;;  %vm1534_vm0 = vcmp.lt.s32.totalorder %v32_v36, 256 }
  0x28   :  { %1279 = vmatpush1.bf16.msra.mxu1 %v1792_v22  ;;  %v1850_v8 = vld [vmem:[#allocation2 + $0x3f4] ss:$8 sps:$4 sm:$0xff]   ;;  %v1852_v10 = vld [vmem:[#allocation2 + $0xf0] ss:$8 sps:$4 sm:$0xff]   ;;  %v35_v11 = vrot.slane %v2116_v50, %v2122_v4  ;;  %v59_v12 = vrot.slane %v2116_v50, %v58_v5  ;;  %v1856_v14 = vld [vmem:[#allocation2 + $0x104] ss:$8 sps:$4 sm:$0xff]  }
  0x29   :  { %1402 = vmatpush1.bf16.msra.mxu0 %v1793_v23  ;;  %1280 = vmatprep.subr.bf16.mxu1 %v1794_v24  ;;  %v1853_v13 = vld [vmem:[#allocation2 + $0x3f0] ss:$8 sps:$4 sm:$0xff]   ;;  %v1859_v15 = vld [vmem:[#allocation2 + $0x404] ss:$8 sps:$4 sm:$0xff]   ;;  %v47_v16 = vrot.slane %v2116_v50, %v46_v9  ;;  %v1854_v17 = vld [vmem:[#allocation2 + $0x100] ss:$8 sps:$4 sm:$0xff]  }
  0x2a   :  { %1403 = vmatprep.subr.bf16.mxu0 %v1796_v25  ;;  %v92_v18 = vpack.c.bf16 %v35_v11, %v35_v11  ;;  %v98_v19 = vpack.c.bf16 %v59_v12, %v59_v12  ;;  %v1857_v20 = vld [vmem:[#allocation2 + $0x400] ss:$8 sps:$4 sm:$0xff]   ;;  %v1862_v21 = vld [vmem:[#allocation2 + $0x114] ss:$8 sps:$4 sm:$0xff]   ;;  %v1860_v24 = vld [vmem:[#allocation2 + $0x110] ss:$8 sps:$4 sm:$0xff]  }
  0x2b   :  { %v1865_v22 = vld [vmem:[#allocation2 + $0x414] ss:$8 sps:$4 sm:$0xff]   ;;  %v95_v23 = vpack.c.bf16 %v47_v16, %v47_v16  ;;  %v1863_v25 = vld [vmem:[#allocation2 + $0x410] ss:$8 sps:$4 sm:$0xff]   ;;  %v2135_v47 = vld [vmem:[%s2169_s0 + $0x8] sm:$0xf] }
  0x2c   :  { %1281 = vmatpush1.bf16.msra.mxu1 %v1798_v26  ;;  %v1868_v26 = vld [vmem:[#allocation2 + $0x124] ss:$8 sps:$4 sm:$0xff]   ;;  %v71_v52 = vrot.slane %v2135_v47, %v2110_v46  ;;  %v1898_v53 = vld [vmem:[#allocation2 + $0x174] ss:$8 sps:$4 sm:$0xff]   ;;  %v1896_v57 = vld [vmem:[#allocation2 + $0x170] ss:$8 sps:$4 sm:$0xff]  }
  0x2d   :  { %1404 = vmatpush1.bf16.msra.mxu0 %v1799_v27  ;;  %1282 = vmatprep.subr.bf16.mxu1 %v1800_v28  ;;  %v1871_v27 = vld [vmem:[#allocation2 + $0x424] ss:$8 sps:$4 sm:$0xff]   ;;  %v1866_v28 = vld [vmem:[#allocation2 + $0x120] ss:$8 sps:$4 sm:$0xff]   ;;  %v1899_v58 = vld [vmem:[#allocation2 + $0x470] ss:$8 sps:$4 sm:$0xff]  }
  0x2e   :  { %1405 = vmatprep.subr.bf16.mxu0 %v1802_v29  ;;  %v1869_v29 = vld [vmem:[#allocation2 + $0x420] ss:$8 sps:$4 sm:$0xff]   ;;  %v1919_v5 = vld [vmem:[#allocation2 + $0x4a4] ss:$8 sps:$4 sm:$0xff]   ;;  %v1920_v11 = vld [vmem:[#allocation2 + $0x1b0] ss:$8 sps:$4 sm:$0xff]  }
  0x2f   :  { %v1923_v12 = vld [vmem:[#allocation2 + $0x4b0] ss:$8 sps:$4 sm:$0xff]   ;;  %v1929_v16 = vld [vmem:[#allocation2 + $0x4c0] ss:$8 sps:$4 sm:$0xff]  }
  0x30   :  { %1283 = vmatpush1.bf16.msra.mxu1 %v1804_v30  ;;  %v1874_v30 = vld [vmem:[#allocation2 + $0x134] ss:$8 sps:$4 sm:$0xff]  }
  0x31   :  { %1406 = vmatpush1.bf16.msra.mxu0 %v1805_v31  ;;  %1284 = vmatprep.subr.bf16.mxu1 %v1806_v32  ;;  %v1877_v31 = vld [vmem:[#allocation2 + $0x434] ss:$8 sps:$4 sm:$0xff]   ;;  %v1872_v32 = vld [vmem:[#allocation2 + $0x130] ss:$8 sps:$4 sm:$0xff]  }
  0x32   :  { %1407 = vmatprep.subr.bf16.mxu0 %v1808_v33  ;;  %v1875_v33 = vld [vmem:[#allocation2 + $0x430] ss:$8 sps:$4 sm:$0xff]  }
  0x34   :  { %1285 = vmatpush1.bf16.msra.mxu1 %v1810_v34  ;;  %v1880_v34 = vld [vmem:[#allocation2 + $0x144] ss:$8 sps:$4 sm:$0xff]  }
  0x35   :  { %1408 = vmatpush1.bf16.msra.mxu0 %v1811_v35  ;;  %1286 = vmatprep.subr.bf16.mxu1 %v1812_v37  ;;  %v1883_v35 = vld [vmem:[#allocation2 + $0x444] ss:$8 sps:$4 sm:$0xff]   ;;  %v1878_v37 = vld [vmem:[#allocation2 + $0x140] ss:$8 sps:$4 sm:$0xff]  }
  0x36   :  { %1409 = vmatprep.subr.bf16.mxu0 %v1814_v38  ;;  %v1881_v38 = vld [vmem:[#allocation2 + $0x440] ss:$8 sps:$4 sm:$0xff]  }
  0x38   :  { %1287 = vmatpush1.bf16.msra.mxu1 %v1816_v39  ;;  %v1886_v39 = vld [vmem:[#allocation2 + $0x154] ss:$8 sps:$4 sm:$0xff]  }
  0x39   :  { %1410 = vmatpush1.bf16.msra.mxu0 %v1817_v41  ;;  %1288 = vmatprep.subr.bf16.mxu1 %v1818_v42  ;;  %v1889_v41 = vld [vmem:[#allocation2 + $0x454] ss:$8 sps:$4 sm:$0xff]   ;;  %v1884_v42 = vld [vmem:[#allocation2 + $0x150] ss:$8 sps:$4 sm:$0xff]  }
  0x3a   :  { %1411 = vmatprep.subr.bf16.mxu0 %v1820_v43  ;;  %v1887_v43 = vld [vmem:[#allocation2 + $0x450] ss:$8 sps:$4 sm:$0xff]  }
  0x3c   :  { %1289 = vmatpush1.bf16.msra.mxu1 %v1822_v44  ;;  %v1892_v44 = vld [vmem:[#allocation2 + $0x164] ss:$8 sps:$4 sm:$0xff]  }
  0x3d   :  { %1412 = vmatpush1.bf16.msra.mxu0 %v1823_v45  ;;  %1290 = vmatprep.subr.bf16.mxu1 %v1824_v48  ;;  %v1895_v45 = vld [vmem:[#allocation2 + $0x464] ss:$8 sps:$4 sm:$0xff]   ;;  %v42_v48 = vsub.s32 2, %v2107_v40 }
  0x3e   :  { %1413 = vmatprep.subr.bf16.mxu0 %v1826_v49  ;;  %v1890_v49 = vld [vmem:[#allocation2 + $0x160] ss:$8 sps:$4 sm:$0xff]  }
  0x40   :  { %1291 = vmatpush1.bf16.msra.mxu1 %v1828_v51  ;;  %v1893_v51 = vld [vmem:[#allocation2 + $0x460] ss:$8 sps:$4 sm:$0xff]  }
  0x41   :  { %1414 = vmatpush1.bf16.msra.mxu0 %v1829_v54  ;;  %1292 = vmatprep.subr.bf16.mxu1 %v1830_v55  ;;  %v1901_v54 = vld [vmem:[#allocation2 + $0x474] ss:$8 sps:$4 sm:$0xff]   ;;  %v2143_v55 = vrot.slane %v2135_v47, %v42_v48 }
  0x42   :  { %1415 = vmatprep.subr.bf16.mxu0 %v1832_v56  ;;  %v101_v56 = vpack.c.bf16 %v71_v52, %v71_v52  ;;  %v1965_v52 = vld [vmem:[#allocation2 + $0x520] ss:$8 sps:$4 sm:$0xff]  }
  0x44   :  { %1293 = vmatpush1.bf16.msra.mxu1 %v1834_v59  ;;  %v1904_v59 = vld [vmem:[#allocation2 + $0x184] ss:$8 sps:$4 sm:$0xff]  }
  0x45   :  { %1416 = vmatpush1.bf16.msra.mxu0 %v1835_v60  ;;  %1294 = vmatprep.subr.bf16.mxu1 %v1836_v61  ;;  %v1907_v60 = vld [vmem:[#allocation2 + $0x484] ss:$8 sps:$4 sm:$0xff]   ;;  %v1902_v61 = vld [vmem:[#allocation2 + $0x180] ss:$8 sps:$4 sm:$0xff]  }
  0x46   :  { %1417 = vmatprep.subr.bf16.mxu0 %v1838_v62  ;;  %v1905_v62 = vld [vmem:[#allocation2 + $0x480] ss:$8 sps:$4 sm:$0xff]  }
  0x48   :  { %1295 = vmatpush1.bf16.msra.mxu1 %v1840_v63  ;;  %v1910_v63 = vld [vmem:[#allocation2 + $0x194] ss:$8 sps:$4 sm:$0xff]  }
  0x49   :  { %1418 = vmatpush1.bf16.msra.mxu0 %v1841_v0  ;;  %1296 = vmatprep.subr.bf16.mxu1 %v1842_v1  ;;  %v1913_v0 = vld [vmem:[#allocation2 + $0x494] ss:$8 sps:$4 sm:$0xff]   ;;  %v1908_v1 = vld [vmem:[#allocation2 + $0x190] ss:$8 sps:$4 sm:$0xff]  }
  0x4a   :  { %1419 = vmatprep.subr.bf16.mxu0 %v1844_v2  ;;  %v1911_v2 = vld [vmem:[#allocation2 + $0x490] ss:$8 sps:$4 sm:$0xff]  }
  0x4c   :  { %1297 = vmatpush1.bf16.msra.mxu1 %v1846_v3  ;;  %v1916_v3 = vld [vmem:[#allocation2 + $0x1a4] ss:$8 sps:$4 sm:$0xff]  }
  0x4d   :  { %1420 = vmatpush1.bf16.msra.mxu0 %v1847_v6  ;;  %1298 = vmatprep.subr.bf16.mxu1 %v1848_v7  ;;  %v1914_v6 = vld [vmem:[#allocation2 + $0x1a0] ss:$8 sps:$4 sm:$0xff]  }
  0x4e   :  { %1421 = vmatprep.subr.bf16.mxu0 %v1850_v8  ;;  %v1917_v7 = vld [vmem:[#allocation2 + $0x4a0] ss:$8 sps:$4 sm:$0xff]   ;;  %v1922_v8 = vld [vmem:[#allocation2 + $0x1b4] ss:$8 sps:$4 sm:$0xff]  }
  0x50   :  { %1299 = vmatpush1.bf16.msra.mxu1 %v1852_v10  ;;  %v1925_v10 = vld [vmem:[#allocation2 + $0x4b4] ss:$8 sps:$4 sm:$0xff]  }
  0x51   :  { %1422 = vmatpush1.bf16.msra.mxu0 %v1853_v13  ;;  %1309 = vmatprep.subr.bf16.mxu1 %v1856_v14  ;;  %v1928_v13 = vld [vmem:[#allocation2 + $0x1c4] ss:$8 sps:$4 sm:$0xff]  }
  0x52   :  { %1432 = vmatprep.subr.bf16.mxu0 %v1859_v15  ;;  %v1931_v14 = vld [vmem:[#allocation2 + $0x4c4] ss:$8 sps:$4 sm:$0xff]   ;;  %v1926_v15 = vld [vmem:[#allocation2 + $0x1c0] ss:$8 sps:$4 sm:$0xff]  }
  0x53   :  { %1301 = vmatmul.mubr.bf16.vlgmr.msra.gmra.mrb[0].mxu1 %v92_v18  ;;  %v1937_v18 = vld [vmem:[#allocation2 + $0x4d4] ss:$8 sps:$4 sm:$0xff]  }
  0x54   :  { %1424 = vmatmul.mubr.bf16.vlgmr.msra.gmra.mrb[0].mxu0 %v98_v19  ;;  %1310 = vmatpush1.bf16.msra.mxu1 %v1854_v17  ;;  %v1934_v17 = vld [vmem:[#allocation2 + $0x1d4] ss:$8 sps:$4 sm:$0xff]   ;;  %v1932_v19 = vld [vmem:[#allocation2 + $0x1d0] ss:$8 sps:$4 sm:$0xff]  }
  0x55   :  { %1433 = vmatpush1.bf16.msra.mxu0 %v1857_v20  ;;  %1311 = vmatprep.subr.bf16.mxu1 %v1862_v21  ;;  %v1935_v20 = vld [vmem:[#allocation2 + $0x4d0] ss:$8 sps:$4 sm:$0xff]   ;;  %v1940_v21 = vld [vmem:[#allocation2 + $0x1e4] ss:$8 sps:$4 sm:$0xff]  }
  0x56   :  { %1434 = vmatprep.subr.bf16.mxu0 %v1865_v22  ;;  %1341 = vmatprep.mubr.bf16.mxu1 %v95_v23  ;;  %v1943_v22 = vld [vmem:[#allocation2 + $0x4e4] ss:$8 sps:$4 sm:$0xff]   ;;  %v1938_v23 = vld [vmem:[#allocation2 + $0x1e0] ss:$8 sps:$4 sm:$0xff]  }
  0x57   :  { %1464 = vmatprep.mubr.bf16.mxu0 %v101_v56  ;;  %v1968_v56 = vld [vmem:[#allocation2 + $0x230] ss:$8 sps:$4 sm:$0xff]  }
  0x58   :  { %1312 = vmatpush1.bf16.msra.mxu1 %v1860_v24  ;;  %v1941_v24 = vld [vmem:[#allocation2 + $0x4e0] ss:$8 sps:$4 sm:$0xff]  }
  0x59   :  { %1435 = vmatpush1.bf16.msra.mxu0 %v1863_v25  ;;  %1313 = vmatprep.subr.bf16.mxu1 %v1868_v26  ;;  %v1946_v25 = vld [vmem:[#allocation2 + $0x1f4] ss:$8 sps:$4 sm:$0xff]  }
  0x5a   :  { %1436 = vmatprep.subr.bf16.mxu0 %v1871_v27  ;;  %v1949_v26 = vld [vmem:[#allocation2 + $0x4f4] ss:$8 sps:$4 sm:$0xff]   ;;  %v54_v27 = vsub.s32 5, %v2107_v40 }
  0x5c   :  { %1314 = vmatpush1.bf16.msra.mxu1 %v1866_v28  ;;  %v43_v28 = vrot.slane %v2116_v50, %v42_v48  ;;  %v1956_v48 = vld [vmem:[#allocation2 + $0x210] ss:$8 sps:$4 sm:$0xff]  }
  0x5d   :  { %1437 = vmatpush1.bf16.msra.mxu0 %v1869_v29  ;;  %1315 = vmatprep.subr.bf16.mxu1 %v1874_v30  ;;  %v67_v29 = vrot.slane %v2135_v47, %v2122_v4  ;;  %v1944_v30 = vld [vmem:[#allocation2 + $0x1f0] ss:$8 sps:$4 sm:$0xff]  }
  0x5e   :  { %1438 = vmatprep.subr.bf16.mxu0 %v1877_v31  ;;  %v1947_v31 = vld [vmem:[#allocation2 + $0x4f0] ss:$8 sps:$4 sm:$0xff]  }
  0x60   :  { %1316 = vmatpush1.bf16.msra.mxu1 %v1872_v32  ;;  %v1952_v32 = vld [vmem:[#allocation2 + $0x204] ss:$8 sps:$4 sm:$0xff]  }
  0x61   :  { %1439 = vmatpush1.bf16.msra.mxu0 %v1875_v33  ;;  %1317 = vmatprep.subr.bf16.mxu1 %v1880_v34  ;;  %v1955_v33 = vld [vmem:[#allocation2 + $0x504] ss:$8 sps:$4 sm:$0xff]   ;;  %v55_v34 = vrot.slane %v2116_v50, %v54_v27  ;;  %v2019_v27 = vld [vmem:[#allocation2 + $0x5b0] ss:$8 sps:$4 sm:$0xff]  }
  0x62   :  { %1440 = vmatprep.subr.bf16.mxu0 %v1883_v35  ;;  %v79_v35 = vrot.slane %v2135_v47, %v46_v9  ;;  %v1964_v9 = vld [vmem:[#allocation2 + $0x224] ss:$8 sps:$4 sm:$0xff]  }
  0x63   :  { %v1967_v47 = vld [vmem:[#allocation2 + $0x524] ss:$8 sps:$4 sm:$0xff]  }
  0x64   :  { %1318 = vmatpush1.bf16.msra.mxu1 %v1878_v37  ;;  %v94_v37 = vpack.c.bf16 %v43_v28, %v43_v28  ;;  %v2024_v28 = vld [vmem:[#allocation2 + $0x2c4] ss:$8 sps:$4 sm:$0xff]  }
  0x65   :  { %1441 = vmatpush1.bf16.msra.mxu0 %v1881_v38  ;;  %1319 = vmatprep.subr.bf16.mxu1 %v1886_v39  ;;  %v100_v38 = vpack.c.bf16 %v67_v29, %v67_v29  ;;  %v1950_v39 = vld [vmem:[#allocation2 + $0x200] ss:$8 sps:$4 sm:$0xff]   ;;  %v2027_v29 = vld [vmem:[#allocation2 + $0x5c4] ss:$8 sps:$4 sm:$0xff]  }
  0x66   :  { %1442 = vmatprep.subr.bf16.mxu0 %v1889_v41  ;;  %v1953_v41 = vld [vmem:[#allocation2 + $0x500] ss:$8 sps:$4 sm:$0xff]  }
  0x68   :  { %1320 = vmatpush1.bf16.msra.mxu1 %v1884_v42  ;;  %v1958_v42 = vld [vmem:[#allocation2 + $0x214] ss:$8 sps:$4 sm:$0xff]  }
  0x69   :  { %1443 = vmatpush1.bf16.msra.mxu0 %v1887_v43  ;;  %1321 = vmatprep.subr.bf16.mxu1 %v1892_v44  ;;  %v1961_v43 = vld [vmem:[#allocation2 + $0x514] ss:$8 sps:$4 sm:$0xff]   ;;  %v97_v44 = vpack.c.bf16 %v55_v34, %v55_v34  ;;  %v2028_v34 = vld [vmem:[#allocation2 + $0x2d0] ss:$8 sps:$4 sm:$0xff]  }
  0x6a   :  { %1444 = vmatprep.subr.bf16.mxu0 %v1895_v45  ;;  %v103_v45 = vpack.c.bf16 %v79_v35, %v79_v35  ;;  %v2031_v35 = vld [vmem:[#allocation2 + $0x5d0] ss:$8 sps:$4 sm:$0xff]  }
  0x6c   :  { %1322 = vmatpush1.bf16.msra.mxu1 %v1890_v49  ;;  %v1959_v49 = vld [vmem:[#allocation2 + $0x510] ss:$8 sps:$4 sm:$0xff]  }
  0x6d   :  { %1445 = vmatpush1.bf16.msra.mxu0 %v1893_v51  ;;  %1323 = vmatprep.subr.bf16.mxu1 %v1898_v53  ;;  %v1962_v51 = vld [vmem:[#allocation2 + $0x220] ss:$8 sps:$4 sm:$0xff]   ;;  %v1970_v53 = vld [vmem:[#allocation2 + $0x234] ss:$8 sps:$4 sm:$0xff]  }
  0x6e   :  { %1446 = vmatprep.subr.bf16.mxu0 %v1901_v54  ;;  %v1973_v54 = vld [vmem:[#allocation2 + $0x534] ss:$8 sps:$4 sm:$0xff]  }
  0x70   :  { %1324 = vmatpush1.bf16.msra.mxu1 %v1896_v57  ;;  %v1971_v57 = vld [vmem:[#allocation2 + $0x530] ss:$8 sps:$4 sm:$0xff]  }
  0x71   :  { %1447 = vmatpush1.bf16.msra.mxu0 %v1899_v58  ;;  %1325 = vmatprep.subr.bf16.mxu1 %v1904_v59  ;;  %v1976_v58 = vld [vmem:[#allocation2 + $0x244] ss:$8 sps:$4 sm:$0xff]  }
  0x72   :  { %1448 = vmatprep.subr.bf16.mxu0 %v1907_v60  ;;  %v1979_v59 = vld [vmem:[#allocation2 + $0x544] ss:$8 sps:$4 sm:$0xff]   ;;  %v1974_v60 = vld [vmem:[#allocation2 + $0x240] ss:$8 sps:$4 sm:$0xff]  }
  0x74   :  { %1326 = vmatpush1.bf16.msra.mxu1 %v1902_v61  ;;  %v1977_v61 = vld [vmem:[#allocation2 + $0x540] ss:$8 sps:$4 sm:$0xff]  }
  0x75   :  { %1449 = vmatpush1.bf16.msra.mxu0 %v1905_v62  ;;  %1327 = vmatprep.subr.bf16.mxu1 %v1910_v63  ;;  %v1982_v62 = vld [vmem:[#allocation2 + $0x254] ss:$8 sps:$4 sm:$0xff]  }
  0x76   :  { %1450 = vmatprep.subr.bf16.mxu0 %v1913_v0  ;;  %v1985_v63 = vld [vmem:[#allocation2 + $0x554] ss:$8 sps:$4 sm:$0xff]   ;;  %v1980_v0 = vld [vmem:[#allocation2 + $0x250] ss:$8 sps:$4 sm:$0xff]  }
  0x78   :  { %1328 = vmatpush1.bf16.msra.mxu1 %v1908_v1  ;;  %v1983_v1 = vld [vmem:[#allocation2 + $0x550] ss:$8 sps:$4 sm:$0xff]  }
  0x79   :  { %1451 = vmatpush1.bf16.msra.mxu0 %v1911_v2  ;;  %1329 = vmatprep.subr.bf16.mxu1 %v1916_v3  ;;  %v1988_v2 = vld [vmem:[#allocation2 + $0x264] ss:$8 sps:$4 sm:$0xff]  }
  0x7a   :  { %1452 = vmatprep.subr.bf16.mxu0 %v1919_v5  ;;  %v1991_v3 = vld [vmem:[#allocation2 + $0x564] ss:$8 sps:$4 sm:$0xff]   ;;  %v1986_v5 = vld [vmem:[#allocation2 + $0x260] ss:$8 sps:$4 sm:$0xff]  }
  0x7c   :  { %1330 = vmatpush1.bf16.msra.mxu1 %v1914_v6  ;;  %v1989_v6 = vld [vmem:[#allocation2 + $0x560] ss:$8 sps:$4 sm:$0xff]  }
  0x7d   :  { %1453 = vmatpush1.bf16.msra.mxu0 %v1917_v7  ;;  %1331 = vmatprep.subr.bf16.mxu1 %v1922_v8  ;;  %v1994_v7 = vld [vmem:[#allocation2 + $0x274] ss:$8 sps:$4 sm:$0xff]  }
  0x7e   :  { %1454 = vmatprep.subr.bf16.mxu0 %v1925_v10  ;;  %v1997_v8 = vld [vmem:[#allocation2 + $0x574] ss:$8 sps:$4 sm:$0xff]   ;;  %v1992_v10 = vld [vmem:[#allocation2 + $0x270] ss:$8 sps:$4 sm:$0xff]  }
  0x80   :  { %1332 = vmatpush1.bf16.msra.mxu1 %v1920_v11  ;;  %v1995_v11 = vld [vmem:[#allocation2 + $0x570] ss:$8 sps:$4 sm:$0xff]  }
  0x81   :  { %1455 = vmatpush1.bf16.msra.mxu0 %v1923_v12  ;;  %1333 = vmatprep.subr.bf16.mxu1 %v1928_v13  ;;  %v2000_v12 = vld [vmem:[#allocation2 + $0x284] ss:$8 sps:$4 sm:$0xff]  }
  0x82   :  { %1456 = vmatprep.subr.bf16.mxu0 %v1931_v14  ;;  %v2003_v13 = vld [vmem:[#allocation2 + $0x584] ss:$8 sps:$4 sm:$0xff]   ;;  %v1998_v14 = vld [vmem:[#allocation2 + $0x280] ss:$8 sps:$4 sm:$0xff]  }
  0x84   :  { %1334 = vmatpush1.bf16.msra.mxu1 %v1926_v15  ;;  %v2001_v15 = vld [vmem:[#allocation2 + $0x580] ss:$8 sps:$4 sm:$0xff]  }
  0x85   :  { %1457 = vmatpush1.bf16.msra.mxu0 %v1929_v16  ;;  %1335 = vmatprep.subr.bf16.mxu1 %v1934_v17  ;;  %v2006_v16 = vld [vmem:[#allocation2 + $0x294] ss:$8 sps:$4 sm:$0xff]  }
  0x86   :  { %1458 = vmatprep.subr.bf16.mxu0 %v1937_v18  ;;  %v2009_v17 = vld [vmem:[#allocation2 + $0x594] ss:$8 sps:$4 sm:$0xff]   ;;  %v2004_v18 = vld [vmem:[#allocation2 + $0x290] ss:$8 sps:$4 sm:$0xff]  }
  0x88   :  { %1336 = vmatpush1.bf16.msra.mxu1 %v1932_v19  ;;  %v2007_v19 = vld [vmem:[#allocation2 + $0x590] ss:$8 sps:$4 sm:$0xff]  }
  0x89   :  { %1459 = vmatpush1.bf16.msra.mxu0 %v1935_v20  ;;  %1337 = vmatprep.subr.bf16.mxu1 %v1940_v21  ;;  %v2012_v20 = vld [vmem:[#allocation2 + $0x2a4] ss:$8 sps:$4 sm:$0xff]  }
  0x8a   :  { %1460 = vmatprep.subr.bf16.mxu0 %v1943_v22  ;;  %v2015_v21 = vld [vmem:[#allocation2 + $0x5a4] ss:$8 sps:$4 sm:$0xff]   ;;  %v2010_v22 = vld [vmem:[#allocation2 + $0x2a0] ss:$8 sps:$4 sm:$0xff]  }
  0x8c   :  { %1338 = vmatpush1.bf16.msra.mxu1 %v1938_v23  ;;  %v2013_v23 = vld [vmem:[#allocation2 + $0x5a0] ss:$8 sps:$4 sm:$0xff]  }
  0x8d   :  { %1461 = vmatpush1.bf16.msra.mxu0 %v1941_v24  ;;  %1339 = vmatprep.subr.bf16.mxu1 %v1946_v25  ;;  %v2018_v24 = vld [vmem:[#allocation2 + $0x2b4] ss:$8 sps:$4 sm:$0xff]  }
  0x8e   :  { %1462 = vmatprep.subr.bf16.mxu0 %v1949_v26  ;;  %v2021_v25 = vld [vmem:[#allocation2 + $0x5b4] ss:$8 sps:$4 sm:$0xff]   ;;  %v2016_v26 = vld [vmem:[#allocation2 + $0x2b0] ss:$8 sps:$4 sm:$0xff]  }
  0x90   :  { %1340 = vmatpush1.bf16.msra.mxu1 %v1944_v30  ;;  %v2022_v30 = vld [vmem:[#allocation2 + $0x2c0] ss:$8 sps:$4 sm:$0xff]  }
  0x91   :  { %1463 = vmatpush1.bf16.msra.mxu0 %v1947_v31  ;;  %1350 = vmatprep.subr.bf16.mxu1 %v1952_v32  ;;  %v2025_v31 = vld [vmem:[#allocation2 + $0x5c0] ss:$8 sps:$4 sm:$0xff]   ;;  %v2030_v32 = vld [vmem:[#allocation2 + $0x2d4] ss:$8 sps:$4 sm:$0xff]  }
  0x92   :  { %1473 = vmatprep.subr.bf16.mxu0 %v1955_v33  ;;  %v2033_v33 = vld [vmem:[#allocation2 + $0x5d4] ss:$8 sps:$4 sm:$0xff]  }
  0x93   :  { %1342 = vmatmul.mubr.bf16.vlgmr.msra.gmra.mrb[0].mxu1 %v94_v37  ;;  %v2036_v37 = vld [vmem:[#allocation2 + $0x2e4] ss:$8 sps:$4 sm:$0xff]  }
  0x94   :  { %1465 = vmatmul.mubr.bf16.vlgmr.msra.gmra.mrb[0].mxu0 %v100_v38  ;;  %1351 = vmatpush1.bf16.msra.mxu1 %v1950_v39  ;;  %v2039_v38 = vld [vmem:[#allocation2 + $0x5e4] ss:$8 sps:$4 sm:$0xff]   ;;  %v50_v39 = vsub.s32 4, %v2107_v40 }
  0x95   :  { %1474 = vmatpush1.bf16.msra.mxu0 %v1953_v41  ;;  %1352 = vmatprep.subr.bf16.mxu1 %v1958_v42  ;;  %v2034_v41 = vld [vmem:[#allocation2 + $0x2e0] ss:$8 sps:$4 sm:$0xff]  }
  0x96   :  { %1475 = vmatprep.subr.bf16.mxu0 %v1961_v43  ;;  %1382 = vmatprep.mubr.bf16.mxu1 %v97_v44  ;;  %v2037_v42 = vld [vmem:[#allocation2 + $0x5e0] ss:$8 sps:$4 sm:$0xff]   ;;  %v2042_v43 = vld [vmem:[#allocation2 + $0x2f4] ss:$8 sps:$4 sm:$0xff]  }
  0x97   :  { %1505 = vmatprep.mubr.bf16.mxu0 %v103_v45  ;;  %v2045_v44 = vld [vmem:[#allocation2 + $0x5f4] ss:$8 sps:$4 sm:$0xff]   ;;  %v51_v45 = vrot.slane %v2116_v50, %v50_v39 }
  0x98   :  { %1353 = vmatpush1.bf16.msra.mxu1 %v1956_v48  ;;  %v2040_v48 = vld [vmem:[#allocation2 + $0x2f0] ss:$8 sps:$4 sm:$0xff]  }
  0x99   :  { %1476 = vmatpush1.bf16.msra.mxu0 %v1959_v49  ;;  %1354 = vmatprep.subr.bf16.mxu1 %v1964_v9  ;;  %v2043_v49 = vld [vmem:[#allocation2 + $0x5f0] ss:$8 sps:$4 sm:$0xff]   ;;  %v96_v9 = vpack.c.bf16 %v51_v45, %v51_v45 }
  0x9a   :  { %1477 = vmatprep.subr.bf16.mxu0 %v1967_v47  ;;  %v102_v47 = vpack.c.bf16 %v2143_v55, %v2143_v55 }
  0x9c   :  { %1355 = vmatpush1.bf16.msra.mxu1 %v1962_v51  ;;  %v296_v51 = vld [vmem:[%s2171_s2] sm:$0x3] }
  0x9d   :  { %1478 = vmatpush1.bf16.msra.mxu0 %v1965_v52  ;;  %1356 = vmatprep.subr.bf16.mxu1 %v1970_v53  ;;  %v2073_v52 = vmov 1966171168   ;;  %v1261_v53 = vrot.slane %v296_v51, %v2122_v4 }
  0x9e   :  { %1479 = vmatprep.subr.bf16.mxu0 %v1973_v54  ;;  %v1518_v50 = vunpack.c.l.s4 %v2073_v52  ;;  %v1265_v54 = vrot.slane %v296_v51, %v2110_v46 }
  0xa0   :  { %1357 = vmatpush1.bf16.msra.mxu1 %v1968_v56 }
  0xa1   :  { %1480 = vmatpush1.bf16.msra.mxu0 %v1971_v57  ;;  %1358 = vmatprep.subr.bf16.mxu1 %v1976_v58  ;;  %v1519_v58 = vunpack.c.0.s8 %v1518_v50 }
  0xa2   :  { %1481 = vmatprep.subr.bf16.mxu0 %v1979_v59 }
  0xa4   :  { %1359 = vmatpush1.bf16.msra.mxu1 %v1974_v60 }
  0xa5   :  { %1482 = vmatpush1.bf16.msra.mxu0 %v1977_v61  ;;  %1360 = vmatprep.subr.bf16.mxu1 %v1982_v62 }
  0xa6   :  { %1483 = vmatprep.subr.bf16.mxu0 %v1985_v63 }
  0xa8   :  { %1361 = vmatpush1.bf16.msra.mxu1 %v1980_v0 }
  0xa9   :  { %1484 = vmatpush1.bf16.msra.mxu0 %v1983_v1  ;;  %1362 = vmatprep.subr.bf16.mxu1 %v1988_v2 }
  0xaa   :  { %1485 = vmatprep.subr.bf16.mxu0 %v1991_v3 }
  0xac   :  { %1363 = vmatpush1.bf16.msra.mxu1 %v1986_v5  ;;  %v1522_v5 = vsub.s32 %v1519_v58, %v2107_v40 }
  0xad   :  { %1486 = vmatpush1.bf16.msra.mxu0 %v1989_v6  ;;  %1364 = vmatprep.subr.bf16.mxu1 %v1994_v7 }
  0xae   :  { %1487 = vmatprep.subr.bf16.mxu0 %v1997_v8 }
  0xb0   :  { %1365 = vmatpush1.bf16.msra.mxu1 %v1992_v10 }
  0xb1   :  { %1488 = vmatpush1.bf16.msra.mxu0 %v1995_v11  ;;  %1366 = vmatprep.subr.bf16.mxu1 %v2000_v12 }
  0xb2   :  { %1489 = vmatprep.subr.bf16.mxu0 %v2003_v13 }
  0xb4   :  { %1367 = vmatpush1.bf16.msra.mxu1 %v1998_v14 }
  0xb5   :  { %1490 = vmatpush1.bf16.msra.mxu0 %v2001_v15  ;;  %1368 = vmatprep.subr.bf16.mxu1 %v2006_v16 }
  0xb6   :  { %1491 = vmatprep.subr.bf16.mxu0 %v2009_v17 }
  0xb8   :  { %1369 = vmatpush1.bf16.msra.mxu1 %v2004_v18 }
  0xb9   :  { %1492 = vmatpush1.bf16.msra.mxu0 %v2007_v19  ;;  %1370 = vmatprep.subr.bf16.mxu1 %v2012_v20 }
  0xba   :  { %1493 = vmatprep.subr.bf16.mxu0 %v2015_v21 }
  0xbc   :  { %1371 = vmatpush1.bf16.msra.mxu1 %v2010_v22 }
  0xbd   :  { %1494 = vmatpush1.bf16.msra.mxu0 %v2013_v23  ;;  %1372 = vmatprep.subr.bf16.mxu1 %v2018_v24 }
  0xbe   :  { %1495 = vmatprep.subr.bf16.mxu0 %v2021_v25 }
  0xc0   :  { %1373 = vmatpush1.bf16.msra.mxu1 %v2016_v26 }
  0xc1   :  { %1496 = vmatpush1.bf16.msra.mxu0 %v2019_v27  ;;  %1374 = vmatprep.subr.bf16.mxu1 %v2024_v28 }
  0xc2   :  { %1497 = vmatprep.subr.bf16.mxu0 %v2027_v29 }
  0xc4   :  { %1375 = vmatpush1.bf16.msra.mxu1 %v2022_v30 }
  0xc5   :  { %1498 = vmatpush1.bf16.msra.mxu0 %v2025_v31  ;;  %1376 = vmatprep.subr.bf16.mxu1 %v2030_v32 }
  0xc6   :  { %1499 = vmatprep.subr.bf16.mxu0 %v2033_v33 }
  0xc8   :  { %1377 = vmatpush1.bf16.msra.mxu1 %v2028_v34 }
  0xc9   :  { %1500 = vmatpush1.bf16.msra.mxu0 %v2031_v35  ;;  %1378 = vmatprep.subr.bf16.mxu1 %v2036_v37 }
  0xca   :  { %1501 = vmatprep.subr.bf16.mxu0 %v2039_v38 }
  0xcc   :  { %1379 = vmatpush1.bf16.msra.mxu1 %v2034_v41 }
  0xcd   :  { %1502 = vmatpush1.bf16.msra.mxu0 %v2037_v42  ;;  %1380 = vmatprep.subr.bf16.mxu1 %v2042_v43 }
  0xce   :  { %1503 = vmatprep.subr.bf16.mxu0 %v2045_v44 }
  0xd0   :  { %1381 = vmatpush1.bf16.msra.mxu1 %v2040_v48 }
  0xd1   :  { %1504 = vmatpush1.bf16.msra.mxu0 %v2043_v49 }
  0xd3   :  { %1383 = vmatmul.mubr.bf16.vlgmr.msra.gmra.mrb[0].mxu1 %v96_v9 }
  0xd4   :  { %1506 = vmatmul.mubr.bf16.vlgmr.msra.gmra.mrb[0].mxu0 %v102_v47 }
 0x1a6   :  { %v1384_v56 = vpop.f32.mrb[0].mxu1 }
 0x1a7   :  { %v1507_v57 = vpop.f32.mrb[0].mxu0  ;;  %v1734_v59 = vadd.f32 %v1384_v56, %v1261_v53  ;;  %v1386_v60 = vpop.f32.mrb[1].mxu1 }
 0x1a8   :  { %v1509_v55 = vpop.f32.mrb[1].mxu0  ;;  %v1736_v61 = vadd.f32 %v1386_v60, %v1265_v54  ;;  %v1388_v62 = vpop.f32.mrb[2].mxu1 }
 0x1a9   :  { %v1511_v63 = vpop.f32.mrb[2].mxu0  ;;  %v1735_v0 = vadd.f32 %v1734_v59, %v1507_v57  ;;  %v1389_v1 = vpop.f32.mrb[3].mxu1 }
 0x1aa   :  { %v1512_v2 = vpop.f32.mrb[3].mxu0  ;;  %v1737_v3 = vadd.f32 %v1736_v61, %v1509_v55 }
 0x1ac   :  { %v1516_v6 = vcombine.low %v1735_v0, %v1737_v3 }
 0x1ae   :  { %v1523_v7 = vrot.slane %v1516_v6, %v1522_v5 }
 0x1b0   :  { %v1530_v46 = vrot.slane %v1523_v7, %v1522_v5 }
 0x1b2   :  { %1536 = vst.msk [vmem:[%s2172_s3] sm:$0x3] %vm1534_vm0, %v1530_v46 }
 0x1b3   :  { %1541 = vsyncpa [#allocation3], 1 }

</bundles_post_ra>
